<compile_context>
chip_gen: v6e
topology: v6e:2x2x1
jax: 0.10.0
libtpu: 0.0.40
codegen_flags: <defaults>
</compile_context>

<pallas_src>
import functools

import jax
import jax.numpy as jnp
from jax import lax
from jax.experimental import pallas as pl
from jax.experimental.pallas import tpu as pltpu


def _hidden_block_kernel(*refs, use_bn, use_skip, dropout_p, eps, n_rows):
    refs = list(refs)
    o_ref = refs.pop()                       # output ref is last (no scratch refs)
    seed_ref, x_ref, w_ref = refs[0], refs[1], refs[2]
    idx = 3
    xs_ref = None
    if use_skip:
        xs_ref = refs[idx]
        idx += 1
    if use_bn:
        gamma_ref, beta_ref = refs[idx], refs[idx + 1]
    else:
        b_ref = refs[idx]

    # Linear: contract D_in (axis 1 of x, axis 1 of W) on the MXU; f32 accumulation.
    y = lax.dot_general(
        x_ref[...], w_ref[...],
        dimension_numbers=(((1,), (1,)), ((), ())),
        preferred_element_type=jnp.float32)                 # (N, TILE) f32

    if use_bn:
        # Training-mode BatchNorm1d forward, single fused stats pass:
        #   mean = E[y], var = E[y^2] - mean^2 (biased), eps = 1e-5.
        # The Linear bias is intentionally omitted: a per-feature bias cancels under BN.
        inv_n = jnp.float32(1.0 / n_rows)
        s1 = jnp.sum(y, axis=0, keepdims=True)
        s2 = jnp.sum(y * y, axis=0, keepdims=True)
        mean = s1 * inv_n
        var = jnp.maximum(s2 * inv_n - mean * mean, 0.0)
        scale = gamma_ref[...] * lax.rsqrt(var + eps)
        shift = beta_ref[...] - mean * scale
        y = y * scale + shift
    else:
        y = y + b_ref[...]

    if use_skip:
        y = y + xs_ref[...].astype(jnp.float32)             # requires D_in == D_hid

    y = jnp.maximum(y, 0.0)                                  # ReLU

    if dropout_p > 0.0:
        # Inverted dropout with a portable counter-based hash PRNG (murmur-style
        # finalizer).  Seeded per feature tile via program_id so tiles decorrelate.
        # TODO(synk): does not reproduce PyTorch's dropout RNG stream (different PRNG).
        keep_prob = 1.0 - dropout_p
        seed = (seed_ref[0].astype(jnp.uint32)
                + pl.program_id(0).astype(jnp.uint32) * jnp.uint32(0x9E3779B1))
        r = lax.broadcasted_iota(jnp.uint32, y.shape, 0)
        c = lax.broadcasted_iota(jnp.uint32, y.shape, 1)
        h = seed + r * jnp.uint32(0x85EBCA77) + c * jnp.uint32(0xC2B2AE3D)
        h = h ^ (h >> 16)
        h = h * jnp.uint32(0x7FEB352D)
        h = h ^ (h >> 15)
        h = h * jnp.uint32(0x846CA68B)
        h = h ^ (h >> 16)
        # Top 24 bits -> uniform in [0, 1) (exact in f32); ~2^-24 quantization bias.
        u = (h >> 8).astype(jnp.int32).astype(jnp.float32) * jnp.float32(1.0 / (1 << 24))
        y = jnp.where(u < jnp.float32(keep_prob),
                      y * jnp.float32(1.0 / keep_prob),
                      jnp.float32(0.0))

    o_ref[...] = y.astype(o_ref.dtype)


def _round_up(v, m):
    return (v + m - 1) // m * m


def hidden_block_forward(x, w, b, gamma=None, beta=None, *, use_bn, use_skip,
                         dropout_p, seed=0, compute_dtype=jnp.float32):
    """Forward pass of Hidden_block.

    x: (N, D_in) f32; w: (D_hid, D_in) (PyTorch nn.Linear layout, NOT pre-transposed);
    b / gamma / beta: (D_hid,).  compute_dtype: dtype fed to the MXU — use jnp.bfloat16
    on v6e/v7x to halve weight DMA bytes (accumulation stays f32 either way).
    """
    n, d_in = x.shape
    d_hid, d_in_w = w.shape
    assert d_in_w == d_in, "weight / input feature-dim mismatch"
    if use_skip:
        assert d_in == d_hid, "skip connection requires input_dim == hidden_dim"

    # Pad feature axes to multiples of 128: lane-dense output blocks (full vst, no masked
    # partial stores) and a tileable feature grid.  Batch axis is never padded/tiled, so
    # BatchNorm statistics stay exact full-batch statistics.
    dip = _round_up(d_in, 128)
    dhp = _round_up(d_hid, 128)

    # Feature-tile size: largest of 512/256/128 dividing the padded width — keeps per-step
    # VMEM (2x double-buffered W tile + out tile + resident x) well under 32 MiB on all
    # generations, including v7x's 64 MiB VMEM.
    if dhp % 512 == 0:
        tile = 512
    elif dhp % 256 == 0:
        tile = 256
    else:
        tile = 128
    grid = (dhp // tile,)

    x_p = jnp.asarray(x, compute_dtype)
    if dip != d_in:
        x_p = jnp.pad(x_p, ((0, 0), (0, dip - d_in)))
    # No wrapper-side transpose: the kernel contracts dim 1 of both operands.
    w_p = jnp.asarray(w, compute_dtype)
    if dhp != d_hid or dip != d_in:
        w_p = jnp.pad(w_p, ((0, dhp - d_hid), (0, dip - d_in)))

    def pad_vec(v):
        v = jnp.asarray(v, jnp.float32)
        if dhp != d_hid:
            v = jnp.pad(v, (0, dhp - d_hid))
        return v.reshape(1, dhp)

    args = [x_p, w_p]
    in_specs = [
        pl.BlockSpec((n, dip), lambda j, s: (0, 0)),        # x (full block, stays resident)
        pl.BlockSpec((tile, dip), lambda j, s: (j, 0)),     # W rows for this feature tile
    ]
    if use_skip:
        args.append(x_p)                                     # feature-sliced view for skip
        in_specs.append(pl.BlockSpec((n, tile), lambda j, s: (0, j)))
    if use_bn:
        args += [pad_vec(gamma), pad_vec(beta)]
        in_specs += [pl.BlockSpec((1, tile), lambda j, s: (0, j)),
                     pl.BlockSpec((1, tile), lambda j, s: (0, j))]
        # Linear bias intentionally NOT passed: it cancels under BatchNorm.
    else:
        args.append(pad_vec(b))
        in_specs.append(pl.BlockSpec((1, tile), lambda j, s: (0, j)))

    kernel = functools.partial(
        _hidden_block_kernel, use_bn=use_bn, use_skip=use_skip,
        dropout_p=float(dropout_p), eps=1e-5, n_rows=n)

    out_p = pl.pallas_call(
        kernel,
        out_shape=jax.ShapeDtypeStruct((n, dhp), jnp.float32),
        grid_spec=pltpu.PrefetchScalarGridSpec(
            num_scalar_prefetch=1,
            grid=grid,
            in_specs=in_specs,
            out_specs=pl.BlockSpec((n, tile), lambda j, s: (0, j)),
        ),
        compiler_params=pltpu.CompilerParams(
            # Feature tiles are fully independent (BN stats are per-feature over the whole
            # batch), so this axis can be sharded across v7x's two TensorCores.
            dimension_semantics=("parallel",)),
    )(jnp.asarray([seed], dtype=jnp.int32), *args)

    return out_p if dhp == d_hid else out_p[:, :d_hid]


def _reference(x, w, b, gamma, beta, use_bn, use_skip):
    """Pure-JAX reference matching PyTorch training-mode forward (dropout omitted)."""
    y = jnp.dot(x, w.T, precision=lax.Precision.HIGHEST) + b
    if use_bn:
        mean = y.mean(0, keepdims=True)
        var = ((y - mean) ** 2).mean(0, keepdims=True)
        y = (y - mean) / jnp.sqrt(var + 1e-5) * gamma + beta
    if use_skip:
        y = y + x
    return jnp.maximum(y, 0.0)


if __name__ == "__main__":
    # Module config: Hidden_block(input_dim=32, hidden_dim=32, BatchNorm1d=True,
    #                             dropout_p=0.1, use_skip_connection=True)
    N, D_IN, D_HID = 8, 32, 32
    USE_BN, USE_SKIP, DROPOUT_P = True, True, 0.1

    key = jax.random.PRNGKey(0)
    kx, kw, kb = jax.random.split(key, 3)
    x = jax.random.normal(kx, (N, D_IN), dtype=jnp.float32)
    w = jax.random.normal(kw, (D_HID, D_IN), dtype=jnp.float32) * 0.1
    b = jax.random.normal(kb, (D_HID,), dtype=jnp.float32) * 0.01
    gamma = jnp.ones((D_HID,), dtype=jnp.float32)    # BatchNorm1d default init
    beta = jnp.zeros((D_HID,), dtype=jnp.float32)

    # Correctness check (dropout disabled so the deterministic path is comparable).
    # Tolerance covers TPU default-precision matmul / fused-BN-stats differences.
    out_nodrop = hidden_block_forward(x, w, b, gamma, beta, use_bn=USE_BN,
                                      use_skip=USE_SKIP, dropout_p=0.0)
    ref = _reference(x, w, b, gamma, beta, USE_BN, USE_SKIP)
    assert out_nodrop.shape == (N, D_HID)
    assert jnp.allclose(out_nodrop, ref, atol=1e-2, rtol=1e-2), "mismatch vs reference"

    # Full forward: dropout active (training-mode semantics), bf16 MXU operands
    # (recommended path on v6e/v7x; accumulation and elementwise math stay f32).
    out = hidden_block_forward(x, w, b, gamma, beta, use_bn=USE_BN,
                               use_skip=USE_SKIP, dropout_p=DROPOUT_P, seed=0,
                               compute_dtype=jnp.bfloat16)
    jax.block_until_ready(out)
    assert out.shape == (N, D_HID) and bool(jnp.all(jnp.isfinite(out)))
    print("KERNEL_OK")
</pallas_src>

<mosaic_0001>
module attributes {stable_mosaic.version = 11 : i64} {
  func.func @_hidden_block_kernel(%arg0: i32, %arg1: memref<1xi32, #tpu.memory_space<smem>>, %arg2: memref<8x128xf32, #tpu.memory_space<vmem>>, %arg3: memref<128x128xf32, #tpu.memory_space<vmem>>, %arg4: memref<8x128xf32, #tpu.memory_space<vmem>>, %arg5: memref<1x128xf32, #tpu.memory_space<vmem>>, %arg6: memref<1x128xf32, #tpu.memory_space<vmem>>, %arg7: memref<8x128xf32, #tpu.memory_space<vmem>>) attributes {dimension_semantics = [#tpu.dimension_semantics<parallel>], iteration_bounds = array<i64: 1>, scalar_prefetch = 1 : i64, scratch_operands = 0 : i64, tpu.core_type = #tpu.core_type<tc>, window_params = [{pipeline_mode = #tpu.pipeline_mode<synchronous>, transform_indices = @transform_0, window_bounds = array<i64: 8, 128>}, {transform_indices = @transform_1, window_bounds = array<i64: 128, 128>}, {transform_indices = @transform_2, window_bounds = array<i64: 8, 128>}, {transform_indices = @transform_3, window_bounds = array<i64: 1, 128>}, {transform_indices = @transform_4, window_bounds = array<i64: 1, 128>}, {transform_indices = @transform_5, window_bounds = array<i64: 8, 128>}]} {
    %c0 = arith.constant 0 : index
    %c0_0 = arith.constant 0 : index
    %0 = vector.load %arg2[%c0, %c0_0] : memref<8x128xf32, #tpu.memory_space<vmem>>, vector<8x128xf32>
    %c0_1 = arith.constant 0 : index
    %c0_2 = arith.constant 0 : index
    %1 = vector.load %arg3[%c0_1, %c0_2] : memref<128x128xf32, #tpu.memory_space<vmem>>, vector<128x128xf32>
    %cst = arith.constant dense<0.000000e+00> : vector<8x128xf32>
    %2 = tpu.matmul %0, %1, %cst {dimension_numbers = #tpu.dot_dimension_numbers<[1], [1], [0], [0], [0, 0, 1, 0], [], []>} : vector<8x128xf32>, vector<128x128xf32>, vector<8x128xf32> -> vector<8x128xf32>
    %cst_3 = arith.constant dense<0.000000e+00> : vector<128xf32>
    %3 = vector.multi_reduction <add>, %2, %cst_3 [0] : vector<8x128xf32> to vector<128xf32>
    %4 = vector.shape_cast %3 : vector<128xf32> to vector<1x128xf32>
    %5 = arith.mulf %2, %2 : vector<8x128xf32>
    %cst_4 = arith.constant dense<0.000000e+00> : vector<128xf32>
    %6 = vector.multi_reduction <add>, %5, %cst_4 [0] : vector<8x128xf32> to vector<128xf32>
    %7 = vector.shape_cast %6 : vector<128xf32> to vector<1x128xf32>
    %cst_5 = arith.constant 1.250000e-01 : f32
    %8 = vector.broadcast %cst_5 : f32 to vector<1x128xf32>
    %9 = arith.mulf %4, %8 : vector<1x128xf32>
    %cst_6 = arith.constant 1.250000e-01 : f32
    %10 = vector.broadcast %cst_6 : f32 to vector<1x128xf32>
    %11 = arith.mulf %7, %10 : vector<1x128xf32>
    %12 = arith.mulf %9, %9 : vector<1x128xf32>
    %13 = arith.subf %11, %12 : vector<1x128xf32>
    %cst_7 = arith.constant 0.000000e+00 : f32
    %14 = vector.broadcast %cst_7 : f32 to vector<1x128xf32>
    %15 = arith.maximumf %13, %14 : vector<1x128xf32>
    %c0_8 = arith.constant 0 : index
    %c0_9 = arith.constant 0 : index
    %16 = vector.load %arg5[%c0_8, %c0_9] : memref<1x128xf32, #tpu.memory_space<vmem>>, vector<1x128xf32>
    %cst_10 = arith.constant 9.99999974E-6 : f32
    %17 = vector.broadcast %cst_10 : f32 to vector<1x128xf32>
    %18 = arith.addf %15, %17 : vector<1x128xf32>
    %19 = math.rsqrt %18 : vector<1x128xf32>
    %20 = arith.mulf %16, %19 : vector<1x128xf32>
    %c0_11 = arith.constant 0 : index
    %c0_12 = arith.constant 0 : index
    %21 = vector.load %arg6[%c0_11, %c0_12] : memref<1x128xf32, #tpu.memory_space<vmem>>, vector<1x128xf32>
    %22 = arith.mulf %9, %20 : vector<1x128xf32>
    %23 = arith.subf %21, %22 : vector<1x128xf32>
    %24 = vector.broadcast %20 : vector<1x128xf32> to vector<8x128xf32>
    %25 = arith.mulf %2, %24 : vector<8x128xf32>
    %26 = vector.broadcast %23 : vector<1x128xf32> to vector<8x128xf32>
    %27 = arith.addf %25, %26 : vector<8x128xf32>
    %c0_13 = arith.constant 0 : index
    %c0_14 = arith.constant 0 : index
    %28 = vector.load %arg4[%c0_13, %c0_14] : memref<8x128xf32, #tpu.memory_space<vmem>>, vector<8x128xf32>
    %29 = arith.addf %27, %28 : vector<8x128xf32>
    %cst_15 = arith.constant 0.000000e+00 : f32
    %30 = vector.broadcast %cst_15 : f32 to vector<8x128xf32>
    %31 = arith.maximumf %29, %30 : vector<8x128xf32>
    %c0_16 = arith.constant 0 : index
    %c0_17 = arith.constant 0 : index
    %32 = vector.load %arg7[%c0_16, %c0_17] : memref<8x128xf32, #tpu.memory_space<vmem>>, vector<8x128xf32>
    tpu.vector_store %arg7[%c0_16, %c0_17], %31 {strides = array<i32>} : memref<8x128xf32, #tpu.memory_space<vmem>>, vector<8x128xf32>,
    return
  }
  func.func @transform_0(%arg0: i32, %arg1: memref<1xi32, #tpu.memory_space<smem>>) -> (i32, i32) {
    %c0_i32 = arith.constant 0 : i32
    %c0_i32_0 = arith.constant 0 : i32
    %c0_i32_1 = arith.constant 0 : i32
    return %c0_i32, %c0_i32_0 : i32, i32
  }
  func.func @transform_1(%arg0: i32, %arg1: memref<1xi32, #tpu.memory_space<smem>>) -> (i32, i32) {
    %c0_i32 = arith.constant 0 : i32
    %c0_i32_0 = arith.constant 0 : i32
    return %arg0, %c0_i32 : i32, i32
  }
  func.func @transform_2(%arg0: i32, %arg1: memref<1xi32, #tpu.memory_space<smem>>) -> (i32, i32) {
    %c0_i32 = arith.constant 0 : i32
    %c0_i32_0 = arith.constant 0 : i32
    return %c0_i32, %arg0 : i32, i32
  }
  func.func @transform_3(%arg0: i32, %arg1: memref<1xi32, #tpu.memory_space<smem>>) -> (i32, i32) {
    %c0_i32 = arith.constant 0 : i32
    %c0_i32_0 = arith.constant 0 : i32
    return %c0_i32, %arg0 : i32, i32
  }
  func.func @transform_4(%arg0: i32, %arg1: memref<1xi32, #tpu.memory_space<smem>>) -> (i32, i32) {
    %c0_i32 = arith.constant 0 : i32
    %c0_i32_0 = arith.constant 0 : i32
    return %c0_i32, %arg0 : i32, i32
  }
  func.func @transform_5(%arg0: i32, %arg1: memref<1xi32, #tpu.memory_space<smem>>) -> (i32, i32) {
    %c0_i32 = arith.constant 0 : i32
    %c0_i32_0 = arith.constant 0 : i32
    return %c0_i32, %arg0 : i32, i32
  }
}

</mosaic_0001>

<bundles_post_ra>
// kernel: tpu_custom_call.1
= control target key start
LH: loop header
LB: loop body
LE: loop exit
PB: predicated region body
PF: predicated region fallthrough
CT: control target
= control target key end

     0   :  { %12 = vsyncpa [#allocation5], 0  ;;  %s415_s0 = inlined_call_operand.<no memory space> [shape: s32[1], index: 0, kind: input, shape index: {}]   ;;  %s416_s1 = inlined_call_operand.hbm [shape: f32[8,128], index: 1, kind: input, shape index: {}]   ;;  %s417_s2 = inlined_call_operand.hbm [shape: f32[128,128], index: 2, kind: input, shape index: {}]   ;;  %s418_s3 = inlined_call_operand.hbm [shape: f32[8,128], index: 3, kind: input, shape index: {}]   ;;  %s419_s4 = inlined_call_operand.vmem [shape: f32[1,128], index: 4, kind: input, shape index: {}]   ;;  %s420_s5 = inlined_call_operand.vmem [shape: f32[1,128], index: 5, kind: input, shape index: {}]   ;;  %s421_s6 = inlined_call_operand.hbm [shape: f32[8,128], index: 6, kind: output, shape index: {}]  }
   0x1   :  { %13 = vsyncpa [#allocation8], 0 }
   0x2   :  { %14 = vsyncpa [#allocation6], 0  ;;  %s354_s0 = smov [#allocation7]  }
   0x3   :  { %s30_s21 = sshll.u32 %s354_s0, 4  ;;  %s31_s21 = int_to_ptr.vmem [resolvable:$true] %s30_s21 }
   0x4   :  { %s276_s22 = scalar_lea.vmem %s31_s21, 2048  ;;  %p281_p1 = scmp.lt.s32.totalorder %s31_s21, %s31_s21 }
   0x5   :  { %p277_p0 = scmp.ne.s32.totalorder %s31_s21, %s276_s22  ;;  %p282_p2 = scmp.lt.s32.totalorder %s276_s22, %s276_s22 }
   0x7   :  { %p283_p3 = por %p282_p2, %p281_p1 }
   0x9   :  { %p284_p4 = pnand %p283_p3, %p277_p0 }
   0xb   :  { %287 = shalt.err (!%p284_p4)
}
   0xc   :  { %s355_s23 = smov 128   ;;  %s356_s24 = smov 8  }
   0xd   :  { %36 = dma.hbm_to_vmem [thread:$0]  %s417_s2, 2048, %s31_s21, [#allocation8], %s355_s23, %s355_s23, %s356_s24  }
   0xe   :  { %s357_s27 = smov [#allocation4]   ;;  %s358_s29 = smov [#allocation9]  }
   0xf   :  { %s21_s28 = sshll.u32 %s357_s27, 4  ;;  %s43_s30 = sshll.u32 %s358_s29, 4  ;;  %s22_s28 = int_to_ptr.vmem [resolvable:$true] %s21_s28  ;;  %s44_s30 = int_to_ptr.vmem [resolvable:$true] %s43_s30 }
  0x10   :  { %s296_s7 = scalar_lea.vmem %s22_s28, 128  ;;  %p301_p6 = scmp.lt.s32.totalorder %s22_s28, %s22_s28 }
  0x11   :  { %p297_p5 = scmp.ne.s32.totalorder %s22_s28, %s296_s7  ;;  %p302_p7 = scmp.lt.s32.totalorder %s296_s7, %s296_s7 }
  0x13   :  { %p303_p8 = por %p302_p7, %p301_p6 }
  0x15   :  { %p304_p9 = pnand %p303_p8, %p297_p5 }
  0x17   :  { %307 = shalt.err (!%p304_p9)
}
  0x18   :  { %24 = dma.hbm_to_vmem [thread:$0]  %s416_s1, 128, %s22_s28, [#allocation5]  }
  0x19   :  { %s316_s10 = scalar_lea.vmem %s44_s30, 128  ;;  %p321_p11 = scmp.lt.s32.totalorder %s44_s30, %s44_s30 }
  0x1a   :  { %p317_p10 = scmp.ne.s32.totalorder %s44_s30, %s316_s10  ;;  %p322_p12 = scmp.lt.s32.totalorder %s316_s10, %s316_s10 }
  0x1c   :  { %p323_p13 = por %p322_p12, %p321_p11 }
  0x1e   :  { %p324_p0 = pnand %p323_p13, %p317_p10 }
  0x20   :  { %327 = shalt.err (!%p324_p0)
}
  0x21   :  { %46 = dma.hbm_to_vmem [thread:$0]  %s418_s3, 128, %s44_s30, [#allocation8]  }
  0x22   :  { %348 = dma.done.wait [#allocation5], 128  }
  0x23   :  { %349 = vsyncadd [#allocation5], 4294967168 }
  0x24   :  { %350 = dma.done.wait [#allocation8], 2176  }
  0x25   :  { %351 = vsyncadd [#allocation8], 4294965120  ;;  %v359_v0 = vmov 0.0   ;;  %vm360_vm0 = vmmov 0   ;;  %v76_v1 = vld [vmem:[#allocation7 + $0x78] sm:$0xff]  ;;  %v75_v2 = vld [vmem:[#allocation7 + $0x70] sm:$0xff]  ;;  %v173_v39 = vlaneseq }
  0x26   :  { %223 = vmatprep.subr.mxu0 %v359_v0  ;;  %255 = vmatprep.mubr.msk.f32.mxu0 %vm360_vm0, %v359_v0  ;;  %v74_v3 = vld [vmem:[#allocation7 + $0x68] sm:$0xff]  ;;  %v73_v4 = vld [vmem:[#allocation7 + $0x60] sm:$0xff]  ;;  %v72_v5 = vld [vmem:[#allocation7 + $0x58] sm:$0xff]  ;;  %s361_s14 = smov [#allocation10]  }
  0x27   :  { %224 = vmatpush3.xpose.msra.mxu0 %v76_v1  ;;  %v71_v6 = vld [vmem:[#allocation7 + $0x50] sm:$0xff]  ;;  %v70_v7 = vld [vmem:[#allocation7 + $0x48] sm:$0xff]  ;;  %v69_v8 = vld [vmem:[#allocation7 + $0x40] sm:$0xff]  ;;  %v174_v40 = vshrl.u32 %v173_v39, 7  ;;  %s196_s15 = sshll.u32 %s361_s14, 4  ;;  %s197_s15 = int_to_ptr.vmem [resolvable:$true] %s196_s15 }
  0x28   :  { %225 = vmatprep.subr.mxu0 %v359_v0  ;;  %v68_v9 = vld [vmem:[#allocation7 + $0x38] sm:$0xff]  ;;  %v67_v10 = vld [vmem:[#allocation7 + $0x30] sm:$0xff]  ;;  %v66_v11 = vld [vmem:[#allocation7 + $0x28] sm:$0xff]  ;;  %p333_p2 = scmp.lt.s32.totalorder %s197_s15, %s197_s15 }
  0x29   :  { %v65_v12 = vld [vmem:[#allocation7 + $0x20] sm:$0xff]  ;;  %v64_v13 = vld [vmem:[#allocation7 + $0x18] sm:$0xff]  ;;  %v63_v14 = vld [vmem:[#allocation7 + $0x10] sm:$0xff]  ;;  %v175_v42 = vsub.s32 0, %v174_v40 }
  0x2a   :  { %v62_v15 = vld [vmem:[#allocation7 + $0x8] sm:$0xff]  ;;  %v61_v16 = vld [vmem:[#allocation7] sm:$0xff]  ;;  %v60_v17 = vld [vmem:[#allocation4] sm:$0xff] }
  0x2b   :  { %226 = vmatpush3.xpose.msra.mxu0 %v75_v2  ;;  %v165_v41 = vld [vmem:[%s419_s4] sm:$0x1]  ;;  %v186_v51 = vld [vmem:[#allocation9] sm:$0xff]  ;;  %s328_s4 = scalar_lea.vmem %s197_s15, 128 }
  0x2c   :  { %227 = vmatprep.subr.mxu0 %v359_v0  ;;  %v169_v45 = vld [vmem:[%s420_s5] sm:$0x1]  ;;  %p329_p1 = scmp.ne.s32.totalorder %s197_s15, %s328_s4  ;;  %p334_p3 = scmp.lt.s32.totalorder %s328_s4, %s328_s4 }
  0x2e   :  { %p335_p4 = por %p334_p3, %p333_p2 }
  0x2f   :  { %228 = vmatpush3.xpose.msra.mxu0 %v74_v3 }
  0x30   :  { %229 = vmatprep.subr.mxu0 %v359_v0  ;;  %p336_p5 = pnand %p335_p4, %p329_p1 }
  0x33   :  { %230 = vmatpush3.xpose.msra.mxu0 %v73_v4 }
  0x34   :  { %231 = vmatprep.subr.mxu0 %v359_v0 }
  0x37   :  { %232 = vmatpush3.xpose.msra.mxu0 %v72_v5 }
  0x38   :  { %233 = vmatprep.subr.mxu0 %v359_v0 }
  0x3b   :  { %234 = vmatpush3.xpose.msra.mxu0 %v71_v6 }
  0x3c   :  { %235 = vmatprep.subr.mxu0 %v359_v0 }
  0x3f   :  { %236 = vmatpush3.xpose.msra.mxu0 %v70_v7 }
  0x40   :  { %237 = vmatprep.subr.mxu0 %v359_v0 }
  0x43   :  { %238 = vmatpush3.xpose.msra.mxu0 %v69_v8 }
  0x44   :  { %239 = vmatprep.subr.mxu0 %v359_v0 }
  0x47   :  { %240 = vmatpush3.xpose.msra.mxu0 %v68_v9 }
  0x48   :  { %241 = vmatprep.subr.mxu0 %v359_v0 }
  0x4b   :  { %242 = vmatpush3.xpose.msra.mxu0 %v67_v10 }
  0x4c   :  { %243 = vmatprep.subr.mxu0 %v359_v0 }
  0x4f   :  { %244 = vmatpush3.xpose.msra.mxu0 %v66_v11 }
  0x50   :  { %245 = vmatprep.subr.mxu0 %v359_v0 }
  0x53   :  { %246 = vmatpush3.xpose.msra.mxu0 %v65_v12 }
  0x54   :  { %247 = vmatprep.subr.mxu0 %v359_v0 }
  0x57   :  { %248 = vmatpush3.xpose.msra.mxu0 %v64_v13 }
  0x58   :  { %249 = vmatprep.subr.mxu0 %v359_v0 }
  0x5b   :  { %250 = vmatpush3.xpose.msra.mxu0 %v63_v14 }
  0x5c   :  { %251 = vmatprep.subr.mxu0 %v359_v0 }
  0x5f   :  { %252 = vmatpush3.xpose.msra.mxu0 %v62_v15 }
  0x60   :  { %253 = vmatprep.subr.mxu0 %v359_v0 }
  0x63   :  { %254 = vmatpush3.xpose.msra.mxu0 %v61_v16 }
  0x66   :  { %256 = vmatmul.mubr.f32.vlgmr.msra.gmra.mxu0 %v60_v17 }
 0x126   :  { %v143_v18 = vpop.f32.mrf.mxu0 }
 0x127   :  { %v147_v19 = vrot.slane %v143_v18, 4  ;;  %v153_v20 = vmul.f32 %v143_v18, %v143_v18 }
 0x128   :  { %v257_v21 = vpop.f32.mrf.mxu0 }
 0x129   :  { %v148_v22 = vadd.f32 %v147_v19, %v143_v18  ;;  %v154_v23 = vrot.slane %v153_v20, 4 }
 0x12b   :  { %v149_v24 = vrot.slane %v148_v22, 2  ;;  %v155_v25 = vadd.f32 %v154_v23, %v153_v20 }
 0x12d   :  { %v150_v26 = vadd.f32 %v149_v24, %v148_v22  ;;  %v156_v27 = vrot.slane %v155_v25, 2 }
 0x12f   :  { %v151_v28 = vrot.slane %v150_v26, 1  ;;  %v157_v29 = vadd.f32 %v156_v27, %v155_v25 }
 0x131   :  { %v152_v30 = vadd.f32 %v151_v28, %v150_v26  ;;  %v158_v31 = vrot.slane %v157_v29, 1 }
 0x133   :  { %v159_v32 = vadd.f32 %v158_v31, %v157_v29  ;;  %v160_v33 = vmul.f32 0.125, %v152_v30 }
 0x135   :  { %v161_v34 = vmul.f32 0.125, %v159_v32  ;;  %v162_v35 = vmul.f32 %v160_v33, %v160_v33 }
 0x137   :  { %v163_v36 = vsub.f32 %v161_v34, %v162_v35 }
 0x139   :  { %v164_v37 = vmax.f32 %v163_v36, 0.0 }
 0x13b   :  { %v166_v38 = vadd.f32 1e-05, %v164_v37 }
 0x13d   :  { %266 = vrsqrt.f32 %v166_v38 }
 0x14a   :  { %v267_v43 = vpop.eup %266 }
 0x14b   :  { %v168_v44 = vmul.f32 %v267_v43, %v165_v41 }
 0x14d   :  { %v170_v46 = vmul.f32 %v168_v44, %v160_v33  ;;  %v176_v47 = vrot.slane %v168_v44, %v175_v42 }
 0x14f   :  { %v171_v48 = vsub.f32 %v169_v45, %v170_v46  ;;  %v178_v49 = vmul.f32 %v176_v47, %v143_v18 }
 0x151   :  { %v183_v50 = vrot.slane %v171_v48, %v175_v42 }
 0x153   :  { %v185_v52 = vadd.f32 %v183_v50, %v178_v49 }
 0x155   :  { %v187_v53 = vadd.f32 %v186_v51, %v185_v52 }
 0x157   :  { %v188_v54 = vmax.f32 %v187_v53, 0.0 }
 0x159   :  { %189 = vst [vmem:[#allocation10] sm:$0xff] %v188_v54 }
 0x15a   :  { %339 = shalt.err (!%p336_p5)
}
 0x15b   :  { %199 = dma.vmem_to_hbm [thread:$0]  %s197_s15, 128, %s421_s6, [#allocation6]  }
 0x15c   :  { %352 = dma.done.wait [#allocation6], 128  }
 0x15d   :  { %353 = vsyncadd [#allocation6], 4294967168 }
 0x15e   :  { %203 = vsyncpa [#allocation5], 1 }
 0x15f   :  { %204 = vsyncpa [#allocation8], 1 }
 0x160   :  { %205 = vsyncpa [#allocation6], 1 }

</bundles_post_ra>
